<compile_context>
chip_gen: v7x
topology: tpu7x:2x2x1
jax: 0.10.0
libtpu: 0.0.40
codegen_flags: <defaults>
</compile_context>

<pallas_src>
import numpy as np
import jax
import jax.numpy as jnp
from jax import lax
from jax.experimental import pallas as pl
from jax.experimental.pallas import tpu as pltpu

NUM_CLASSES = 27      # vocabulary size: '_ACDEFGHIKLMNPQRSTVWYXBZJUO'
ALPHABET_SIZE = 21    # embedding width (20 amino acids + 'X')
_DEFAULT_TILE_N = 8192  # flattened rows per grid step (multiple of 8 and 128)


def _make_encoding_table_np() -> np.ndarray:
    """(27, 21) pseudo one-hot table (used by the pure-JAX reference)."""
    t = np.zeros((NUM_CLASSES, ALPHABET_SIZE), dtype=np.float32)
    for c in range(1, ALPHABET_SIZE + 1):   # plain one-hot for vocab 1..21
        t[c, c - 1] = 1.0
    t[22, 2] = 0.5
    t[22, 11] = 0.5                          # B = 0.5 D + 0.5 N
    t[23, 3] = 0.5
    t[23, 13] = 0.5                          # Z = 0.5 E + 0.5 Q
    t[24, 7] = 0.5
    t[24, 9] = 0.5                           # J = 0.5 I + 0.5 L
    return t                                 # rows 0, 25, 26 stay all-zero


def _encoding_table_bf16() -> jnp.ndarray:
    """Build the (27, 21) table in-kernel from iota compares.

    Synthesizing it from iotas (instead of passing it as an operand) removes
    the per-step table DMA and its BlockSpec; it costs only ~a dozen vector
    ops on a single-vreg-sized tile and lowers cleanly in Mosaic.
    """
    k = lax.broadcasted_iota(jnp.int32, (NUM_CLASSES, ALPHABET_SIZE), 0)
    c = lax.broadcasted_iota(jnp.int32, (NUM_CLASSES, ALPHABET_SIZE), 1)
    t = (k == c + 1).astype(jnp.float32)                        # one-hot rows 1..21
    t = t + 0.5 * ((k == 22) & ((c == 2) | (c == 11))).astype(jnp.float32)
    t = t + 0.5 * ((k == 23) & ((c == 3) | (c == 13))).astype(jnp.float32)
    t = t + 0.5 * ((k == 24) & ((c == 7) | (c == 9))).astype(jnp.float32)
    return t.astype(jnp.bfloat16)                               # 0 / 0.5 / 1: exact


def _pseudo_onehot_kernel(seq_ref, out_ref):
    # seq_ref: (1, tile_n) int32   -- flattened (B*L) indices for this tile
    # out_ref: (tile_n, 21) float32
    idx = seq_ref[...]                                  # (1, tile_n), lane-major
    tile_n = idx.shape[1]

    # Transposed one-hot (27, tile_n): rows = vocab class (sublanes), columns =
    # sequence positions (lanes). Lane-dense, bf16, no relayout of `idx`
    # (the (1, tile_n) -> (27, tile_n) broadcast is a cheap sublane broadcast).
    klass = lax.broadcasted_iota(jnp.int32, (NUM_CLASSES, tile_n), 0)
    onehot_t = (klass == idx).astype(jnp.bfloat16)

    table = _encoding_table_bf16()                      # (27, 21) constant

    # out[r, c] = table[idx[r], c]: contract the class axis (dim 0 of both
    # operands) on the MXU with f32 accumulation -> (tile_n, 21).
    out_ref[...] = lax.dot_general(
        onehot_t, table,
        dimension_numbers=(((0,), (0,)), ((), ())),
        preferred_element_type=jnp.float32)


def pseudo_one_hot_encoding(sequence: jnp.ndarray,
                            *, tile_n: int = _DEFAULT_TILE_N) -> jnp.ndarray:
    """sequence: (B, L) integers in [0, 26]. Returns (B, L, 21) float32."""
    seq = jnp.asarray(sequence).astype(jnp.int32)
    if seq.ndim != 2:
        raise ValueError(f"expected (batch, length) sequence, got {seq.shape}")
    b, l = seq.shape
    n = b * l
    if n == 0:
        return jnp.zeros((b, l, ALPHABET_SIZE), jnp.float32)

    # Single exact block for small inputs; otherwise fixed 8192-row tiles
    # (the trailing partial tile is handled by Pallas boundary masking).
    if n <= tile_n:
        tile_n = n

    seq_flat = seq.reshape(1, n)
    grid = (pl.cdiv(n, tile_n),)

    out_flat = pl.pallas_call(
        _pseudo_onehot_kernel,
        out_shape=jax.ShapeDtypeStruct((n, ALPHABET_SIZE), jnp.float32),
        grid_spec=pltpu.PrefetchScalarGridSpec(
            num_scalar_prefetch=0,
            grid=grid,
            in_specs=[pl.BlockSpec((1, tile_n), lambda i: (0, i))],
            out_specs=pl.BlockSpec((tile_n, ALPHABET_SIZE), lambda i: (i, 0)),
        ),
        compiler_params=pltpu.CompilerParams(
            dimension_semantics=("parallel",),   # shard tiles across TCs on v7x
            vmem_limit_bytes=32 * 1024 * 1024,   # explicit budget (fits v7x too)
        ),
    )(seq_flat)
    return out_flat.reshape(b, l, ALPHABET_SIZE)


def _reference(sequence: jnp.ndarray) -> jnp.ndarray:
    """Pure-JAX reference: straight table lookup."""
    table = jnp.asarray(_make_encoding_table_np())
    return jnp.take(table, jnp.asarray(sequence).astype(jnp.int32), axis=0)


if __name__ == "__main__":
    key = jax.random.PRNGKey(0)
    B, L = 2, 16
    # indices over the full 27-symbol vocabulary '_ACDEFGHIKLMNPQRSTVWYXBZJUO'
    seq = jax.random.randint(key, (B, L), minval=0, maxval=NUM_CLASSES,
                             dtype=jnp.int32)
    # exercise the ambiguous letters B/Z/J and the all-zero rows _/U/O
    seq = seq.at[0, 0].set(22).at[0, 1].set(23).at[0, 2].set(24)
    seq = seq.at[1, 0].set(0).at[1, 1].set(25).at[1, 2].set(26)

    out = jax.block_until_ready(pseudo_one_hot_encoding(seq))
    ref = _reference(seq)

    np.testing.assert_allclose(np.asarray(out), np.asarray(ref),
                               rtol=0.0, atol=0.0)
    assert out.shape == (B, L, ALPHABET_SIZE)
    assert out.dtype == jnp.float32
    print("KERNEL_OK")
</pallas_src>

<mosaic_0001>
module attributes {stable_mosaic.version = 11 : i64} {
  func.func @_pseudo_onehot_kernel(%arg0: i32, %arg1: memref<1x32xi32, #tpu.memory_space<vmem>>, %arg2: memref<32x21xf32, #tpu.memory_space<vmem>>) attributes {dimension_semantics = [#tpu.dimension_semantics<parallel>], iteration_bounds = array<i64: 1>, scalar_prefetch = 0 : i64, scratch_operands = 0 : i64, tpu.core_type = #tpu.core_type<tc>, window_params = [{transform_indices = @transform_0, window_bounds = array<i64: 1, 32>}, {transform_indices = @transform_1, window_bounds = array<i64: 32, 21>}]} {
    %c0 = arith.constant 0 : index
    %c0_0 = arith.constant 0 : index
    %0 = vector.load %arg1[%c0, %c0_0] : memref<1x32xi32, #tpu.memory_space<vmem>>, vector<1x32xi32>
    %1 = tpu.iota {dimensions = array<i32: 0>} : vector<27x32xi32>
    %2 = vector.broadcast %0 : vector<1x32xi32> to vector<27x32xi32>
    %3 = arith.cmpi eq, %1, %2 : vector<27x32xi32>
    %4 = arith.extui %3 : vector<27x32xi1> to vector<27x32xi32>
    %5 = arith.sitofp %4 : vector<27x32xi32> to vector<27x32xf32>
    %6 = arith.truncf %5 : vector<27x32xf32> to vector<27x32xbf16>
    %7 = tpu.iota {dimensions = array<i32: 0>} : vector<27x21xi32>
    %8 = tpu.iota {dimensions = array<i32: 1>} : vector<27x21xi32>
    %c1_i32 = arith.constant 1 : i32
    %9 = vector.broadcast %c1_i32 : i32 to vector<27x21xi32>
    %10 = arith.addi %8, %9 : vector<27x21xi32>
    %11 = arith.cmpi eq, %7, %10 : vector<27x21xi32>
    %12 = arith.extui %11 : vector<27x21xi1> to vector<27x21xi32>
    %13 = arith.sitofp %12 : vector<27x21xi32> to vector<27x21xf32>
    %c22_i32 = arith.constant 22 : i32
    %14 = vector.broadcast %c22_i32 : i32 to vector<27x21xi32>
    %15 = arith.cmpi eq, %7, %14 : vector<27x21xi32>
    %c2_i32 = arith.constant 2 : i32
    %16 = vector.broadcast %c2_i32 : i32 to vector<27x21xi32>
    %17 = arith.cmpi eq, %8, %16 : vector<27x21xi32>
    %c11_i32 = arith.constant 11 : i32
    %18 = vector.broadcast %c11_i32 : i32 to vector<27x21xi32>
    %19 = arith.cmpi eq, %8, %18 : vector<27x21xi32>
    %20 = arith.ori %17, %19 : vector<27x21xi1>
    %21 = arith.andi %15, %20 : vector<27x21xi1>
    %22 = arith.extui %21 : vector<27x21xi1> to vector<27x21xi32>
    %23 = arith.sitofp %22 : vector<27x21xi32> to vector<27x21xf32>
    %cst = arith.constant 5.000000e-01 : f32
    %24 = vector.broadcast %cst : f32 to vector<27x21xf32>
    %25 = arith.mulf %24, %23 : vector<27x21xf32>
    %26 = arith.addf %13, %25 : vector<27x21xf32>
    %c23_i32 = arith.constant 23 : i32
    %27 = vector.broadcast %c23_i32 : i32 to vector<27x21xi32>
    %28 = arith.cmpi eq, %7, %27 : vector<27x21xi32>
    %c3_i32 = arith.constant 3 : i32
    %29 = vector.broadcast %c3_i32 : i32 to vector<27x21xi32>
    %30 = arith.cmpi eq, %8, %29 : vector<27x21xi32>
    %c13_i32 = arith.constant 13 : i32
    %31 = vector.broadcast %c13_i32 : i32 to vector<27x21xi32>
    %32 = arith.cmpi eq, %8, %31 : vector<27x21xi32>
    %33 = arith.ori %30, %32 : vector<27x21xi1>
    %34 = arith.andi %28, %33 : vector<27x21xi1>
    %35 = arith.extui %34 : vector<27x21xi1> to vector<27x21xi32>
    %36 = arith.sitofp %35 : vector<27x21xi32> to vector<27x21xf32>
    %cst_1 = arith.constant 5.000000e-01 : f32
    %37 = vector.broadcast %cst_1 : f32 to vector<27x21xf32>
    %38 = arith.mulf %37, %36 : vector<27x21xf32>
    %39 = arith.addf %26, %38 : vector<27x21xf32>
    %c24_i32 = arith.constant 24 : i32
    %40 = vector.broadcast %c24_i32 : i32 to vector<27x21xi32>
    %41 = arith.cmpi eq, %7, %40 : vector<27x21xi32>
    %c7_i32 = arith.constant 7 : i32
    %42 = vector.broadcast %c7_i32 : i32 to vector<27x21xi32>
    %43 = arith.cmpi eq, %8, %42 : vector<27x21xi32>
    %c9_i32 = arith.constant 9 : i32
    %44 = vector.broadcast %c9_i32 : i32 to vector<27x21xi32>
    %45 = arith.cmpi eq, %8, %44 : vector<27x21xi32>
    %46 = arith.ori %43, %45 : vector<27x21xi1>
    %47 = arith.andi %41, %46 : vector<27x21xi1>
    %48 = arith.extui %47 : vector<27x21xi1> to vector<27x21xi32>
    %49 = arith.sitofp %48 : vector<27x21xi32> to vector<27x21xf32>
    %cst_2 = arith.constant 5.000000e-01 : f32
    %50 = vector.broadcast %cst_2 : f32 to vector<27x21xf32>
    %51 = arith.mulf %50, %49 : vector<27x21xf32>
    %52 = arith.addf %39, %51 : vector<27x21xf32>
    %53 = arith.truncf %52 : vector<27x21xf32> to vector<27x21xbf16>
    %cst_3 = arith.constant dense<0.000000e+00> : vector<32x21xf32>
    %54 = tpu.matmul %6, %53, %cst_3 {dimension_numbers = #tpu.dot_dimension_numbers<[0], [0], [1], [1], [0, 1, 1, 1], [], []>} : vector<27x32xbf16>, vector<27x21xbf16>, vector<32x21xf32> -> vector<32x21xf32>
    %c0_4 = arith.constant 0 : index
    %c0_5 = arith.constant 0 : index
    %55 = vector.load %arg2[%c0_4, %c0_5] : memref<32x21xf32, #tpu.memory_space<vmem>>, vector<32x21xf32>
    tpu.vector_store %arg2[%c0_4, %c0_5], %54 {strides = array<i32>} : memref<32x21xf32, #tpu.memory_space<vmem>>, vector<32x21xf32>,
    return
  }
  func.func @transform_0(%arg0: i32) -> (i32, i32) {
    %c0_i32 = arith.constant 0 : i32
    %c0_i32_0 = arith.constant 0 : i32
    return %c0_i32, %arg0 : i32, i32
  }
  func.func @transform_1(%arg0: i32) -> (i32, i32) {
    %c0_i32 = arith.constant 0 : i32
    %c0_i32_0 = arith.constant 0 : i32
    return %arg0, %c0_i32 : i32, i32
  }
}

</mosaic_0001>

<bundles_post_ra>
// kernel: tpu_custom_call.1
= control target key start
LH: loop header
LB: loop body
LE: loop exit
PB: predicated region body
PF: predicated region fallthrough
CT: control target
= control target key end

     0   :  { %6 = vsyncpa [#allocation3], 0  ;;  %s289_s6 = smov [#allocation2]   ;;  %s346_s0 = inlined_call_operand.hbm [shape: s32[1,32], index: 0, kind: input, shape index: {}]   ;;  %s347_s1 = inlined_call_operand.vmem [shape: f32[32,21], index: 1, kind: output, shape index: {}]  }
   0x1   :  { %s13_s7 = sshll.u32 %s289_s6, 4  ;;  %s265_s10 = scalar_lea.hbm %s346_s0, 16  ;;  %s14_s7 = int_to_ptr.vmem [resolvable:$true] %s13_s7 }
   0x2   :  { %p266_p0 = scmp.ne.s32.totalorder %s346_s0, %s265_s10  ;;  %p269_p1 = scmp.lt.u32.totalorder %s265_s10, %s346_s0 }
   0x4   :  { %p271_p2 = pnand %p269_p1, %p266_p0 }
   0x6   :  { %274 = shalt.err (!%p271_p2)
}
   0x7   :  { %s275_s15 = scalar_lea.vmem %s14_s7, 16  ;;  %s279_s16 = scalar_lea.vmem %s14_s7, 32 }
   0x8   :  { %p276_p3 = scmp.ne.s32.totalorder %s14_s7, %s275_s15  ;;  %p280_p4 = scmp.lt.s32.totalorder %s14_s7, %s14_s7 }
   0x9   :  { %p281_p5 = scmp.lt.s32.totalorder %s279_s16, %s275_s15 }
   0xb   :  { %p282_p6 = por %p281_p5, %p280_p4 }
   0xd   :  { %p283_p7 = pnand %p282_p6, %p276_p3 }
   0xf   :  { %286 = shalt.err (!%p283_p7)
}
  0x10   :  { %16 = dma.hbm_to_vmem [thread:$0]  %s346_s0, 16, %s14_s7, [#allocation3]  }
  0x11   :  { %287 = dma.done.wait [#allocation3], 16  }
  0x12   :  { %288 = vsyncadd [#allocation3], 4294967280  ;;  %v22_v0 = vlaneseq  ;;  %v232_v8 = vld [vmem:[#allocation2] ss:$0 sm:$0xff]  ;;  %v290_v10 = vmov 1.0|1.0  }
  0x13   :  { %v291_v11 = vmov 0.0   ;;  %v292_v28 = vmov 65535  }
  0x14   :  { %v23_v1 = vshrl.u32 %v22_v0, 7  ;;  %v46_v2 = vand.u32 127, %v22_v0 }
  0x16   :  { %v24_v3 = vadd.s32 8, %v23_v1  ;;  %v25_v4 = vadd.s32 16, %v23_v1  ;;  %v26_v5 = vadd.s32 24, %v23_v1  ;;  %v47_v6 = vadd.s32 1, %v46_v2 }
  0x17   :  { %vm64_vm0 = vcmp.eq.s32.totalorder %v46_v2, 2  ;;  %vm65_vm1 = vcmp.eq.s32.totalorder %v46_v2, 11  ;;  %vm91_vm5 = vcmp.eq.s32.totalorder %v46_v2, 3  ;;  %vm92_vm6 = vcmp.eq.s32.totalorder %v46_v2, 13 }
  0x18   :  { %vm48_vm2 = vcmp.eq.s32.totalorder %v23_v1, %v47_v6  ;;  %vm49_vm3 = vcmp.eq.s32.totalorder %v24_v3, %v47_v6  ;;  %vm315_vm4 = vmor %vm64_vm0, %vm65_vm1  ;;  %vm50_vm8 = vcmp.eq.s32.totalorder %v25_v4, %v47_v6  ;;  %vm51_vm9 = vcmp.eq.s32.totalorder %v26_v5, %v47_v6 }
  0x19   :  { %vm319_vm7 = vmpackc.low %vm49_vm3, %vm48_vm2  ;;  %vm62_vm10 = vcmp.eq.s32.totalorder %v25_v4, 22  ;;  %vm89_vm11 = vcmp.eq.s32.totalorder %v25_v4, 23  ;;  %vm31_vm12 = vcmp.eq.s32.totalorder %v23_v1, %v232_v8  ;;  %vm32_vm13 = vcmp.eq.s32.totalorder %v24_v3, %v232_v8 }
  0x1a   :  { %vm33_vm14 = vcmp.eq.s32.totalorder %v25_v4, %v232_v8  ;;  %vm34_vm15 = vcmp.eq.s32.totalorder %v26_v5, %v232_v8  ;;  %252 = vmatprep.subr.msk.bf16.mxu0 %vm319_vm7, %v290_v10  ;;  %vm69_vm0 = vmand %vm62_vm10, %vm315_vm4  ;;  %v233_v12 = vsel %vm31_vm12, 1.0, %v291_v11  ;;  %v234_v13 = vsel %vm32_vm13, 1.0, %v291_v11 }
  0x1b   :  { %v235_v14 = vsel %vm33_vm14, 1.0, %v291_v11  ;;  %v236_v15 = vsel %vm34_vm15, 1.0, %v291_v11  ;;  %253 = vmatpush3.bf16.msk.msra.mxu0 %vm319_vm7, %v290_v10  ;;  %vm93_vm1 = vmor %vm91_vm5, %vm92_vm6  ;;  %v43_v16 = vpack.c.bf16 %v234_v13, %v233_v12  ;;  %v239_v17 = vsel %vm50_vm8, 1.0, %v291_v11 }
  0x1c   :  { %v241_v18 = vsel %vm69_vm0, 1.0, %v291_v11  ;;  %vm96_vm2 = vmand %vm89_vm11, %vm93_vm1  ;;  %vm117_vm3 = vcmp.eq.s32.totalorder %v26_v5, 24  ;;  %vm118_vm4 = vcmp.eq.s32.totalorder %v46_v2, 7  ;;  %vm119_vm10 = vcmp.eq.s32.totalorder %v46_v2, 9 }
  0x1d   :  { %v81_v19 = vmul.f32 0.5, %v241_v18  ;;  %v242_v20 = vsel %vm96_vm2, 1.0, %v291_v11  ;;  %143 = vxpose.xlu0.c.b16.start [1/2] (short) (narrow) %v43_v16, 32  ;;  %v44_v21 = vpack.c.bf16 %v236_v15, %v235_v14  ;;  %vm120_vm12 = vmor %vm118_vm4, %vm119_vm10  ;;  %vm166_vm13 = vcmask 1044480  }
  0x1e   :  { %v108_v22 = vmul.f32 0.5, %v242_v20  ;;  %vm124_vm7 = vmand %vm117_vm3, %vm120_vm12  ;;  %v240_v24 = vsel %vm51_vm9, 1.0, %v291_v11  ;;  %vm167_vm5 = vcmask 1045504   ;;  %v168_v29 = vsel %vm166_vm13, 4294967295, %v292_v28 }
  0x1f   :  { %v85_v23 = vadd.f32 %v239_v17, %v81_v19  ;;  %v243_v25 = vsel %vm124_vm7, 1.0, %v291_v11  ;;  %v169_v31 = vsel %vm167_vm5, %v168_v29, 0  ;;  %vm159_vm6 = vcmask 220160  }
  0x20   :  { %v136_v27 = vmul.f32 0.5, %v243_v25  ;;  %vm222_vm8 = vcmask 171008  }
  0x21   :  { %v112_v26 = vadd.f32 %v108_v22, %v85_v23  ;;  %144 = vxpose.xlu0.c.b16.end [2/2] (short) (narrow) %v44_v21, 32 }
  0x22   :  { %v140_v30 = vadd.f32 %v240_v24, %v136_v27 }
  0x24   :  { %v142_v32 = vpack.c.bf16 %v140_v30, %v112_v26 }
  0x26   :  { %v171_v33 = vand.u32 %v169_v31, %v142_v32 }
  0x28   :  { %254 = vmatprep.subr.bf16.mxu0 %v171_v33 }
  0x29   :  { %255 = vmatpush3.bf16.msra.mxu0 %v171_v33 }
  0x83   :  { %v151_v34 = vpop.trf.xlu0 }
  0x84   :  { %256 = vmatprep.mubr.msk.bf16.mxu0 %vm159_vm6, %v151_v34 }
  0x87   :  { %v152_v35 = vpop.trf.xlu0 }
  0x88   :  { %257 = vmatmul.mubr.msk.bf16.vlgmr.msra.gmra.mrb[0].mxu0 %vm159_vm6, %v152_v35 }
 0x15b   :  { %v258_v36 = vpop.f32.mrb[0].mxu0 }
 0x15c   :  { %225 = vst.msk [vmem:[%s347_s1 + $0x10] sm:$0xff] %vm222_vm8, %v258_v36  ;;  %v207_v37 = vpop.f32.mrb[1].mxu0 }
 0x15d   :  { %223 = vst.msk [vmem:[%s347_s1] sm:$0xff] %vm222_vm8, %v207_v37  ;;  %v259_v38 = vpop.f32.mrb[2].mxu0 }
 0x15e   :  { %226 = vst.msk [vmem:[%s347_s1 + $0x18] sm:$0xff] %vm222_vm8, %v259_v38  ;;  %v210_v39 = vpop.f32.mrb[3].mxu0 }
 0x15f   :  { %224 = vst.msk [vmem:[%s347_s1 + $0x8] sm:$0xff] %vm222_vm8, %v210_v39 }
 0x160   :  { %231 = vsyncpa [#allocation3], 1 }

</bundles_post_ra>
